<compile_context>
chip_gen: v6e
topology: v6e:2x2x1
jax: 0.10.0
libtpu: 0.0.40
codegen_flags: <defaults>
</compile_context>

<pallas_src>
from typing import List

import jax
import jax.numpy as jnp
from jax import lax
from jax.experimental import pallas as pl
from jax.experimental.pallas import tpu as pltpu

LN_EPS = 1e-5
SUMS_PAD = 128  # lane-dense width for the packed per-layer sums output


def _make_fused_ff_kernel(num_layers: int):
    """Kernel ref order: x, (w0, b0, w1, b1, ...), out, sums."""

    def kernel(*refs):
        x_ref = refs[0]
        wb_refs = refs[1:1 + 2 * num_layers]
        out_ref = refs[1 + 2 * num_layers]
        sums_ref = refs[2 + 2 * num_layers]

        h = x_ref[...]                      # (tile_b, Din) f32, resident in VMEM
        tile_b = h.shape[0]

        # Hoisted once (JAX does not CSE broadcast_in_dim inside the loop).
        lane = lax.broadcasted_iota(jnp.int32, (1, SUMS_PAD), 1)
        # Per-layer sum-of-squares lands in lane l of this accumulator; the
        # single cross-sublane reduce happens once, after the layer loop.
        ss_acc = jnp.zeros((tile_b, SUMS_PAD), jnp.float32)

        for l in range(num_layers):
            w = wb_refs[2 * l][...]         # (Din_l, Dout_l), pre-transposed for MXU
            b = wb_refs[2 * l + 1][...]     # (1, Dout_l)

            # Linear (f32 operands, f32 accumulation -> matches the f32
            # PyTorch reference).
            # TODO(synk): cast h/w to bf16 (keep preferred_element_type=f32)
            # once the matmuls are actually MXU-bound on v6e/v7x; that loosens
            # the 1e-4 output match against the f32 reference.
            y = jnp.dot(h, w, preferred_element_type=jnp.float32) + b

            # LayerNorm over last dim, elementwise_affine=False (biased var).
            mean = jnp.mean(y, axis=-1, keepdims=True)
            c = y - mean
            csq = c * c
            var = jnp.mean(csq, axis=-1, keepdims=True)
            act = jnp.maximum(c * lax.rsqrt(var + LN_EPS), 0.0)   # ReLU

            # sum(act**2): reuse csq -> relu(c*rsqrt)^2 == (c>0) * c^2/(var+eps)
            row_ss = (jnp.sum(jnp.where(c > 0.0, csq, 0.0),
                              axis=-1, keepdims=True)
                      / (var + LN_EPS))                            # (tile_b, 1)
            ss_acc = ss_acc + jnp.where(lane == l, row_ss, 0.0)

            # Activation stays in VMEM/vregs between layers; no HBM writeback.
            # X.detach() in the PyTorch module is autograd-only -> no-op here.
            h = act

        out_ref[...] = h
        # ONE sublane reduce + ONE unmasked, lane-dense (1, 128) store.
        sums_ref[...] = jnp.sum(ss_acc, axis=0, keepdims=True)

    return kernel


def _pick_row_tile(B: int) -> int:
    """Row tile: whole batch when small; split (parallel grid) when large."""
    if B >= 512:
        for t in (512, 256, 128):
            if B % t == 0:
                return t
    return B


def _vmem_footprint_bytes(d_in: int, d_out_last: int, tile_b: int, params) -> int:
    itemsize = 4  # f32
    w_bytes = sum(w.size + b.size for (w, b) in params) * itemsize
    io_bytes = (tile_b * d_in + tile_b * d_out_last + SUMS_PAD) * itemsize
    act_bytes = tile_b * max(w.shape[1] for (w, _) in params) * itemsize * 4
    # 2x: Pallas double-buffers pipelined operands.
    return 2 * (w_bytes + io_bytes) + act_bytes


def fused_ff_forward(x2d, params):
    """One pallas_call for the whole layer stack.

    Weights total well under 1 MiB f32 at these sizes, so every layer's
    weight/bias lives in VMEM for the whole call (constant block index ->
    fetched once, never re-DMA'd across grid steps).
    """
    num_layers = len(params)
    assert num_layers <= SUMS_PAD, "packed sums row holds at most 128 layers"
    B, d_in = x2d.shape
    d_out_last = params[-1][0].shape[1]

    tile_b = _pick_row_tile(B)
    num_tiles = B // tile_b

    flat = []
    in_specs = [pl.BlockSpec((tile_b, d_in), lambda i: (i, 0))]
    for (w, b) in params:
        flat.extend((w, b))
        # Full-array blocks with a constant index map: resident in VMEM.
        in_specs.append(pl.BlockSpec(w.shape, lambda i: (0, 0)))
        in_specs.append(pl.BlockSpec(b.shape, lambda i: (0, 0)))

    out_specs = (
        pl.BlockSpec((tile_b, d_out_last), lambda i: (i, 0)),
        pl.BlockSpec((1, SUMS_PAD), lambda i: (i, 0)),
    )

    # Scoped-VMEM guard: v5e default is 16 MiB, v6e/v7x 32 MiB. Only raise the
    # limit when the resident-weights design actually needs it (never past the
    # v7x 64 MiB physical ceiling). At the demo shapes this stays at defaults.
    est = _vmem_footprint_bytes(d_in, d_out_last, tile_b, params)
    compiler_kwargs = {"dimension_semantics": ("parallel",)}
    if est > 12 * 1024 * 1024:
        compiler_kwargs["vmem_limit_bytes"] = int(min(2 * est, 56 * 1024 * 1024))
    # TODO(synk): once total weights approach the v7x 64 MiB VMEM ceiling, add a
    # K/N grid axis (marked "arbitrary") with a VMEM scratch accumulator instead
    # of keeping every layer resident.
    # TODO(synk): for a fixed-weights inference loop, pin the weights in VMEM
    # across calls (cross-pallas_call residency) instead of re-DMAing ~0.4 MB
    # of weights every invocation.

    out, sums_rows = pl.pallas_call(
        _make_fused_ff_kernel(num_layers),
        out_shape=(
            jax.ShapeDtypeStruct((B, d_out_last), jnp.float32),
            jax.ShapeDtypeStruct((num_tiles, SUMS_PAD), jnp.float32),
        ),
        grid=(num_tiles,),
        in_specs=in_specs,
        out_specs=out_specs,
        compiler_params=pltpu.CompilerParams(**compiler_kwargs),
    )(x2d, *flat)

    if num_tiles == 1:
        sums_vec = sums_rows[0, :num_layers]
    else:
        sums_vec = jnp.sum(sums_rows, axis=0)[:num_layers]
    return out, sums_vec


def init_ff_params(key, input_size: int, layer_sizes: List[int]):
    """PyTorch nn.Linear-style init: U(-1/sqrt(fan_in), 1/sqrt(fan_in)).

    Weights are stored pre-transposed as (fan_in, fan_out) so they feed the MXU
    directly (no in-kernel transpose); biases as (1, fan_out).
    """
    params = []
    fan_in = input_size
    for layer_size in layer_sizes:
        key, kw, kb = jax.random.split(key, 3)
        bound = 1.0 / jnp.sqrt(fan_in)
        w = jax.random.uniform(kw, (fan_in, layer_size), jnp.float32, -bound, bound)
        b = jax.random.uniform(kb, (1, layer_size), jnp.float32, -bound, bound)
        params.append((w, b))
        fan_in = layer_size
    return params


@jax.jit
def ff_model_forward(x, params):
    # X.flatten(start_dim=1)
    B = x.shape[0]
    h = x.reshape(B, -1).astype(jnp.float32)
    return fused_ff_forward(h, params)


def _reference_forward(x, params):
    B = x.shape[0]
    h = x.reshape(B, -1).astype(jnp.float32)
    sums = []
    for (w, b) in params:
        y = h @ w + b
        mean = jnp.mean(y, axis=-1, keepdims=True)
        var = jnp.mean((y - mean) ** 2, axis=-1, keepdims=True)
        h = jnp.maximum((y - mean) / jnp.sqrt(var + LN_EPS), 0.0)
        sums.append(jnp.sum(h * h))
    return h, jnp.stack(sums)


if __name__ == "__main__":
    key = jax.random.PRNGKey(0)
    k_in, k_params = jax.random.split(key)

    # Input: batch=8 (fills all 8 f32 sublanes per vreg), channels=4, 8x8
    # spatial -> flattened feature dim 256.
    x = jax.random.normal(k_in, (8, 4, 8, 8), dtype=jnp.float32)
    input_size = 4 * 8 * 8
    layer_sizes = [128, 256, 128]

    params = init_ff_params(k_params, input_size, layer_sizes)

    out, sums = ff_model_forward(x, params)
    out = jax.block_until_ready(out)
    sums = jax.block_until_ready(sums)

    # Correctness check against a pure-JAX reference.
    ref_out, ref_sums = _reference_forward(x, params)
    assert out.shape == ref_out.shape, "output shape mismatch"
    assert jnp.allclose(out, ref_out, atol=1e-4, rtol=1e-4), "output mismatch"
    assert sums.shape == (len(layer_sizes),), "sums shape mismatch"
    assert jnp.allclose(sums, ref_sums, atol=1e-2, rtol=1e-4), "sum-squared mismatch"

    print("KERNEL_OK")
</pallas_src>

<mosaic_0001>
module attributes {stable_mosaic.version = 11 : i64} {
  func.func @kernel(%arg0: i32, %arg1: memref<8x256xf32, #tpu.memory_space<vmem>>, %arg2: memref<256x128xf32, #tpu.memory_space<vmem>>, %arg3: memref<1x128xf32, #tpu.memory_space<vmem>>, %arg4: memref<128x256xf32, #tpu.memory_space<vmem>>, %arg5: memref<1x256xf32, #tpu.memory_space<vmem>>, %arg6: memref<256x128xf32, #tpu.memory_space<vmem>>, %arg7: memref<1x128xf32, #tpu.memory_space<vmem>>, %arg8: memref<8x128xf32, #tpu.memory_space<vmem>>, %arg9: memref<1x128xf32, #tpu.memory_space<vmem>>) attributes {dimension_semantics = [#tpu.dimension_semantics<parallel>], iteration_bounds = array<i64: 1>, scalar_prefetch = 0 : i64, scratch_operands = 0 : i64, tpu.core_type = #tpu.core_type<tc>, window_params = [{transform_indices = @transform_0, window_bounds = array<i64: 8, 256>}, {pipeline_mode = #tpu.pipeline_mode<synchronous>, transform_indices = @transform_1, window_bounds = array<i64: 256, 128>}, {pipeline_mode = #tpu.pipeline_mode<synchronous>, transform_indices = @transform_2, window_bounds = array<i64: 1, 128>}, {pipeline_mode = #tpu.pipeline_mode<synchronous>, transform_indices = @transform_3, window_bounds = array<i64: 128, 256>}, {pipeline_mode = #tpu.pipeline_mode<synchronous>, transform_indices = @transform_4, window_bounds = array<i64: 1, 256>}, {pipeline_mode = #tpu.pipeline_mode<synchronous>, transform_indices = @transform_5, window_bounds = array<i64: 256, 128>}, {pipeline_mode = #tpu.pipeline_mode<synchronous>, transform_indices = @transform_6, window_bounds = array<i64: 1, 128>}, {transform_indices = @transform_7, window_bounds = array<i64: 8, 128>}, {transform_indices = @transform_8, window_bounds = array<i64: 1, 128>}]} {
    %c0 = arith.constant 0 : index
    %c0_0 = arith.constant 0 : index
    %0 = vector.load %arg1[%c0, %c0_0] : memref<8x256xf32, #tpu.memory_space<vmem>>, vector<8x256xf32>
    %1 = tpu.iota {dimensions = array<i32: 1>} : vector<1x128xi32>
    %cst = arith.constant 0.000000e+00 : f32
    %2 = vector.broadcast %cst : f32 to vector<8x128xf32>
    %c0_1 = arith.constant 0 : index
    %c0_2 = arith.constant 0 : index
    %3 = vector.load %arg2[%c0_1, %c0_2] : memref<256x128xf32, #tpu.memory_space<vmem>>, vector<256x128xf32>
    %c0_3 = arith.constant 0 : index
    %c0_4 = arith.constant 0 : index
    %4 = vector.load %arg3[%c0_3, %c0_4] : memref<1x128xf32, #tpu.memory_space<vmem>>, vector<1x128xf32>
    %cst_5 = arith.constant dense<0.000000e+00> : vector<8x128xf32>
    %5 = tpu.matmul %0, %3, %cst_5 {dimension_numbers = #tpu.dot_dimension_numbers<[1], [0], [0], [1], [0, 0, 1, 1], [], []>} : vector<8x256xf32>, vector<256x128xf32>, vector<8x128xf32> -> vector<8x128xf32>
    %6 = vector.broadcast %4 : vector<1x128xf32> to vector<8x128xf32>
    %7 = arith.addf %5, %6 : vector<8x128xf32>
    %cst_6 = arith.constant dense<0.000000e+00> : vector<8xf32>
    %8 = vector.multi_reduction <add>, %7, %cst_6 [1] : vector<8x128xf32> to vector<8xf32>
    %9 = vector.shape_cast %8 : vector<8xf32> to vector<8x1xf32>
    %cst_7 = arith.constant 1.280000e+02 : f32
    %10 = vector.broadcast %cst_7 : f32 to vector<8x1xf32>
    %11 = arith.divf %9, %10 : vector<8x1xf32>
    %12 = vector.broadcast %11 : vector<8x1xf32> to vector<8x128xf32>
    %13 = arith.subf %7, %12 : vector<8x128xf32>
    %14 = arith.mulf %13, %13 : vector<8x128xf32>
    %cst_8 = arith.constant dense<0.000000e+00> : vector<8xf32>
    %15 = vector.multi_reduction <add>, %14, %cst_8 [1] : vector<8x128xf32> to vector<8xf32>
    %16 = vector.shape_cast %15 : vector<8xf32> to vector<8x1xf32>
    %cst_9 = arith.constant 1.280000e+02 : f32
    %17 = vector.broadcast %cst_9 : f32 to vector<8x1xf32>
    %18 = arith.divf %16, %17 : vector<8x1xf32>
    %cst_10 = arith.constant 9.99999974E-6 : f32
    %19 = vector.broadcast %cst_10 : f32 to vector<8x1xf32>
    %20 = arith.addf %18, %19 : vector<8x1xf32>
    %21 = math.rsqrt %20 : vector<8x1xf32>
    %22 = vector.broadcast %21 : vector<8x1xf32> to vector<8x128xf32>
    %23 = arith.mulf %13, %22 : vector<8x128xf32>
    %cst_11 = arith.constant 0.000000e+00 : f32
    %24 = vector.broadcast %cst_11 : f32 to vector<8x128xf32>
    %25 = arith.maximumf %23, %24 : vector<8x128xf32>
    %cst_12 = arith.constant 0.000000e+00 : f32
    %26 = vector.broadcast %cst_12 : f32 to vector<8x128xf32>
    %27 = arith.cmpf ogt, %13, %26 : vector<8x128xf32>
    %cst_13 = arith.constant 0.000000e+00 : f32
    %28 = vector.broadcast %cst_13 : f32 to vector<8x128xf32>
    %29 = arith.select %27, %14, %28 : vector<8x128xi1>, vector<8x128xf32>
    %cst_14 = arith.constant dense<0.000000e+00> : vector<8xf32>
    %30 = vector.multi_reduction <add>, %29, %cst_14 [1] : vector<8x128xf32> to vector<8xf32>
    %31 = vector.shape_cast %30 : vector<8xf32> to vector<8x1xf32>
    %cst_15 = arith.constant 9.99999974E-6 : f32
    %32 = vector.broadcast %cst_15 : f32 to vector<8x1xf32>
    %33 = arith.addf %18, %32 : vector<8x1xf32>
    %34 = arith.divf %31, %33 : vector<8x1xf32>
    %c0_i32 = arith.constant 0 : i32
    %35 = vector.broadcast %c0_i32 : i32 to vector<1x128xi32>
    %36 = arith.cmpi eq, %1, %35 : vector<1x128xi32>
    %cst_16 = arith.constant 0.000000e+00 : f32
    %37 = vector.shape_cast %36 : vector<1x128xi1> to vector<1x128xi1>
    %38 = vector.broadcast %37 : vector<1x128xi1> to vector<8x128xi1>
    %39 = vector.shape_cast %34 : vector<8x1xf32> to vector<8x1xf32>
    %40 = vector.broadcast %39 : vector<8x1xf32> to vector<8x128xf32>
    %41 = vector.broadcast %cst_16 : f32 to vector<8x128xf32>
    %42 = arith.select %38, %40, %41 : vector<8x128xi1>, vector<8x128xf32>
    %43 = arith.addf %2, %42 : vector<8x128xf32>
    %c0_17 = arith.constant 0 : index
    %c0_18 = arith.constant 0 : index
    %44 = vector.load %arg4[%c0_17, %c0_18] : memref<128x256xf32, #tpu.memory_space<vmem>>, vector<128x256xf32>
    %c0_19 = arith.constant 0 : index
    %c0_20 = arith.constant 0 : index
    %45 = vector.load %arg5[%c0_19, %c0_20] : memref<1x256xf32, #tpu.memory_space<vmem>>, vector<1x256xf32>
    %cst_21 = arith.constant dense<0.000000e+00> : vector<8x256xf32>
    %46 = tpu.matmul %25, %44, %cst_21 {dimension_numbers = #tpu.dot_dimension_numbers<[1], [0], [0], [1], [0, 0, 1, 1], [], []>} : vector<8x128xf32>, vector<128x256xf32>, vector<8x256xf32> -> vector<8x256xf32>
    %47 = vector.broadcast %45 : vector<1x256xf32> to vector<8x256xf32>
    %48 = arith.addf %46, %47 : vector<8x256xf32>
    %cst_22 = arith.constant dense<0.000000e+00> : vector<8xf32>
    %49 = vector.multi_reduction <add>, %48, %cst_22 [1] : vector<8x256xf32> to vector<8xf32>
    %50 = vector.shape_cast %49 : vector<8xf32> to vector<8x1xf32>
    %cst_23 = arith.constant 2.560000e+02 : f32
    %51 = vector.broadcast %cst_23 : f32 to vector<8x1xf32>
    %52 = arith.divf %50, %51 : vector<8x1xf32>
    %53 = vector.broadcast %52 : vector<8x1xf32> to vector<8x256xf32>
    %54 = arith.subf %48, %53 : vector<8x256xf32>
    %55 = arith.mulf %54, %54 : vector<8x256xf32>
    %cst_24 = arith.constant dense<0.000000e+00> : vector<8xf32>
    %56 = vector.multi_reduction <add>, %55, %cst_24 [1] : vector<8x256xf32> to vector<8xf32>
    %57 = vector.shape_cast %56 : vector<8xf32> to vector<8x1xf32>
    %cst_25 = arith.constant 2.560000e+02 : f32
    %58 = vector.broadcast %cst_25 : f32 to vector<8x1xf32>
    %59 = arith.divf %57, %58 : vector<8x1xf32>
    %cst_26 = arith.constant 9.99999974E-6 : f32
    %60 = vector.broadcast %cst_26 : f32 to vector<8x1xf32>
    %61 = arith.addf %59, %60 : vector<8x1xf32>
    %62 = math.rsqrt %61 : vector<8x1xf32>
    %63 = vector.broadcast %62 : vector<8x1xf32> to vector<8x256xf32>
    %64 = arith.mulf %54, %63 : vector<8x256xf32>
    %cst_27 = arith.constant 0.000000e+00 : f32
    %65 = vector.broadcast %cst_27 : f32 to vector<8x256xf32>
    %66 = arith.maximumf %64, %65 : vector<8x256xf32>
    %cst_28 = arith.constant 0.000000e+00 : f32
    %67 = vector.broadcast %cst_28 : f32 to vector<8x256xf32>
    %68 = arith.cmpf ogt, %54, %67 : vector<8x256xf32>
    %cst_29 = arith.constant 0.000000e+00 : f32
    %69 = vector.broadcast %cst_29 : f32 to vector<8x256xf32>
    %70 = arith.select %68, %55, %69 : vector<8x256xi1>, vector<8x256xf32>
    %cst_30 = arith.constant dense<0.000000e+00> : vector<8xf32>
    %71 = vector.multi_reduction <add>, %70, %cst_30 [1] : vector<8x256xf32> to vector<8xf32>
    %72 = vector.shape_cast %71 : vector<8xf32> to vector<8x1xf32>
    %cst_31 = arith.constant 9.99999974E-6 : f32
    %73 = vector.broadcast %cst_31 : f32 to vector<8x1xf32>
    %74 = arith.addf %59, %73 : vector<8x1xf32>
    %75 = arith.divf %72, %74 : vector<8x1xf32>
    %c1_i32 = arith.constant 1 : i32
    %76 = vector.broadcast %c1_i32 : i32 to vector<1x128xi32>
    %77 = arith.cmpi eq, %1, %76 : vector<1x128xi32>
    %cst_32 = arith.constant 0.000000e+00 : f32
    %78 = vector.shape_cast %77 : vector<1x128xi1> to vector<1x128xi1>
    %79 = vector.broadcast %78 : vector<1x128xi1> to vector<8x128xi1>
    %80 = vector.shape_cast %75 : vector<8x1xf32> to vector<8x1xf32>
    %81 = vector.broadcast %80 : vector<8x1xf32> to vector<8x128xf32>
    %82 = vector.broadcast %cst_32 : f32 to vector<8x128xf32>
    %83 = arith.select %79, %81, %82 : vector<8x128xi1>, vector<8x128xf32>
    %84 = arith.addf %43, %83 : vector<8x128xf32>
    %c0_33 = arith.constant 0 : index
    %c0_34 = arith.constant 0 : index
    %85 = vector.load %arg6[%c0_33, %c0_34] : memref<256x128xf32, #tpu.memory_space<vmem>>, vector<256x128xf32>
    %c0_35 = arith.constant 0 : index
    %c0_36 = arith.constant 0 : index
    %86 = vector.load %arg7[%c0_35, %c0_36] : memref<1x128xf32, #tpu.memory_space<vmem>>, vector<1x128xf32>
    %cst_37 = arith.constant dense<0.000000e+00> : vector<8x128xf32>
    %87 = tpu.matmul %66, %85, %cst_37 {dimension_numbers = #tpu.dot_dimension_numbers<[1], [0], [0], [1], [0, 0, 1, 1], [], []>} : vector<8x256xf32>, vector<256x128xf32>, vector<8x128xf32> -> vector<8x128xf32>
    %88 = vector.broadcast %86 : vector<1x128xf32> to vector<8x128xf32>
    %89 = arith.addf %87, %88 : vector<8x128xf32>
    %cst_38 = arith.constant dense<0.000000e+00> : vector<8xf32>
    %90 = vector.multi_reduction <add>, %89, %cst_38 [1] : vector<8x128xf32> to vector<8xf32>
    %91 = vector.shape_cast %90 : vector<8xf32> to vector<8x1xf32>
    %cst_39 = arith.constant 1.280000e+02 : f32
    %92 = vector.broadcast %cst_39 : f32 to vector<8x1xf32>
    %93 = arith.divf %91, %92 : vector<8x1xf32>
    %94 = vector.broadcast %93 : vector<8x1xf32> to vector<8x128xf32>
    %95 = arith.subf %89, %94 : vector<8x128xf32>
    %96 = arith.mulf %95, %95 : vector<8x128xf32>
    %cst_40 = arith.constant dense<0.000000e+00> : vector<8xf32>
    %97 = vector.multi_reduction <add>, %96, %cst_40 [1] : vector<8x128xf32> to vector<8xf32>
    %98 = vector.shape_cast %97 : vector<8xf32> to vector<8x1xf32>
    %cst_41 = arith.constant 1.280000e+02 : f32
    %99 = vector.broadcast %cst_41 : f32 to vector<8x1xf32>
    %100 = arith.divf %98, %99 : vector<8x1xf32>
    %cst_42 = arith.constant 9.99999974E-6 : f32
    %101 = vector.broadcast %cst_42 : f32 to vector<8x1xf32>
    %102 = arith.addf %100, %101 : vector<8x1xf32>
    %103 = math.rsqrt %102 : vector<8x1xf32>
    %104 = vector.broadcast %103 : vector<8x1xf32> to vector<8x128xf32>
    %105 = arith.mulf %95, %104 : vector<8x128xf32>
    %cst_43 = arith.constant 0.000000e+00 : f32
    %106 = vector.broadcast %cst_43 : f32 to vector<8x128xf32>
    %107 = arith.maximumf %105, %106 : vector<8x128xf32>
    %cst_44 = arith.constant 0.000000e+00 : f32
    %108 = vector.broadcast %cst_44 : f32 to vector<8x128xf32>
    %109 = arith.cmpf ogt, %95, %108 : vector<8x128xf32>
    %cst_45 = arith.constant 0.000000e+00 : f32
    %110 = vector.broadcast %cst_45 : f32 to vector<8x128xf32>
    %111 = arith.select %109, %96, %110 : vector<8x128xi1>, vector<8x128xf32>
    %cst_46 = arith.constant dense<0.000000e+00> : vector<8xf32>
    %112 = vector.multi_reduction <add>, %111, %cst_46 [1] : vector<8x128xf32> to vector<8xf32>
    %113 = vector.shape_cast %112 : vector<8xf32> to vector<8x1xf32>
    %cst_47 = arith.constant 9.99999974E-6 : f32
    %114 = vector.broadcast %cst_47 : f32 to vector<8x1xf32>
    %115 = arith.addf %100, %114 : vector<8x1xf32>
    %116 = arith.divf %113, %115 : vector<8x1xf32>
    %c2_i32 = arith.constant 2 : i32
    %117 = vector.broadcast %c2_i32 : i32 to vector<1x128xi32>
    %118 = arith.cmpi eq, %1, %117 : vector<1x128xi32>
    %cst_48 = arith.constant 0.000000e+00 : f32
    %119 = vector.shape_cast %118 : vector<1x128xi1> to vector<1x128xi1>
    %120 = vector.broadcast %119 : vector<1x128xi1> to vector<8x128xi1>
    %121 = vector.shape_cast %116 : vector<8x1xf32> to vector<8x1xf32>
    %122 = vector.broadcast %121 : vector<8x1xf32> to vector<8x128xf32>
    %123 = vector.broadcast %cst_48 : f32 to vector<8x128xf32>
    %124 = arith.select %120, %122, %123 : vector<8x128xi1>, vector<8x128xf32>
    %125 = arith.addf %84, %124 : vector<8x128xf32>
    %c0_49 = arith.constant 0 : index
    %c0_50 = arith.constant 0 : index
    %126 = vector.load %arg8[%c0_49, %c0_50] : memref<8x128xf32, #tpu.memory_space<vmem>>, vector<8x128xf32>
    tpu.vector_store %arg8[%c0_49, %c0_50], %107 {strides = array<i32>} : memref<8x128xf32, #tpu.memory_space<vmem>>, vector<8x128xf32>,
    %cst_51 = arith.constant dense<0.000000e+00> : vector<128xf32>
    %127 = vector.multi_reduction <add>, %125, %cst_51 [0] : vector<8x128xf32> to vector<128xf32>
    %128 = vector.shape_cast %127 : vector<128xf32> to vector<1x128xf32>
    %c0_52 = arith.constant 0 : index
    %c0_53 = arith.constant 0 : index
    %129 = vector.load %arg9[%c0_52, %c0_53] : memref<1x128xf32, #tpu.memory_space<vmem>>, vector<1x128xf32>
    tpu.vector_store %arg9[%c0_52, %c0_53], %128 {strides = array<i32>} : memref<1x128xf32, #tpu.memory_space<vmem>>, vector<1x128xf32>,
    return
  }
  func.func @transform_0(%arg0: i32) -> (i32, i32) {
    %c0_i32 = arith.constant 0 : i32
    %c0_i32_0 = arith.constant 0 : i32
    return %arg0, %c0_i32 : i32, i32
  }
  func.func @transform_1(%arg0: i32) -> (i32, i32) {
    %c0_i32 = arith.constant 0 : i32
    %c0_i32_0 = arith.constant 0 : i32
    %c0_i32_1 = arith.constant 0 : i32
    return %c0_i32, %c0_i32_0 : i32, i32
  }
  func.func @transform_2(%arg0: i32) -> (i32, i32) {
    %c0_i32 = arith.constant 0 : i32
    %c0_i32_0 = arith.constant 0 : i32
    %c0_i32_1 = arith.constant 0 : i32
    return %c0_i32, %c0_i32_0 : i32, i32
  }
  func.func @transform_3(%arg0: i32) -> (i32, i32) {
    %c0_i32 = arith.constant 0 : i32
    %c0_i32_0 = arith.constant 0 : i32
    %c0_i32_1 = arith.constant 0 : i32
    return %c0_i32, %c0_i32_0 : i32, i32
  }
  func.func @transform_4(%arg0: i32) -> (i32, i32) {
    %c0_i32 = arith.constant 0 : i32
    %c0_i32_0 = arith.constant 0 : i32
    %c0_i32_1 = arith.constant 0 : i32
    return %c0_i32, %c0_i32_0 : i32, i32
  }
  func.func @transform_5(%arg0: i32) -> (i32, i32) {
    %c0_i32 = arith.constant 0 : i32
    %c0_i32_0 = arith.constant 0 : i32
    %c0_i32_1 = arith.constant 0 : i32
    return %c0_i32, %c0_i32_0 : i32, i32
  }
  func.func @transform_6(%arg0: i32) -> (i32, i32) {
    %c0_i32 = arith.constant 0 : i32
    %c0_i32_0 = arith.constant 0 : i32
    %c0_i32_1 = arith.constant 0 : i32
    return %c0_i32, %c0_i32_0 : i32, i32
  }
  func.func @transform_7(%arg0: i32) -> (i32, i32) {
    %c0_i32 = arith.constant 0 : i32
    %c0_i32_0 = arith.constant 0 : i32
    return %arg0, %c0_i32 : i32, i32
  }
  func.func @transform_8(%arg0: i32) -> (i32, i32) {
    %c0_i32 = arith.constant 0 : i32
    %c0_i32_0 = arith.constant 0 : i32
    return %arg0, %c0_i32 : i32, i32
  }
}

</mosaic_0001>

<bundles_post_ra>
// kernel: ff_model_forward.1
= control target key start
LH: loop header
LB: loop body
LE: loop exit
PB: predicated region body
PF: predicated region fallthrough
CT: control target
= control target key end

     0   :  { %14 = vsyncpa [#allocation3], 0  ;;  %s861_s0 = inlined_call_operand.vmem [shape: f32[8,256], index: 0, kind: input, shape index: {}]   ;;  %s862_s1 = inlined_call_operand.vmem [shape: f32[256,128], index: 1, kind: input, shape index: {}]   ;;  %s863_s2 = inlined_call_operand.vmem [shape: f32[1,128], index: 2, kind: input, shape index: {}]   ;;  %s864_s3 = inlined_call_operand.hbm [shape: f32[128,256], index: 3, kind: input, shape index: {}]   ;;  %s865_s4 = inlined_call_operand.vmem [shape: f32[1,256], index: 4, kind: input, shape index: {}]   ;;  %s866_s5 = inlined_call_operand.hbm [shape: f32[256,128], index: 5, kind: input, shape index: {}]   ;;  %s867_s6 = inlined_call_operand.vmem [shape: f32[1,128], index: 6, kind: input, shape index: {}]   ;;  %s868_s7 = inlined_call_operand.hbm [shape: f32[8,128], index: 7, kind: output, shape index: {0}]   ;;  %s869_s8 = inlined_call_operand.vmem [shape: f32[1,128], index: 8, kind: output, shape index: {1}]  }
   0x1   :  { %15 = vsyncpa [#allocation6], 0 }
   0x2   :  { %16 = vsyncpa [#allocation4], 0  ;;  %s660_s27 = smov [#allocation2]  }
   0x3   :  { %s28_s28 = sshll.u32 %s660_s27, 4  ;;  %s29_s28 = int_to_ptr.vmem [resolvable:$true] %s28_s28 }
   0x4   :  { %s602_s29 = scalar_lea.vmem %s29_s28, 4096  ;;  %p607_p1 = scmp.lt.s32.totalorder %s29_s28, %s29_s28 }
   0x5   :  { %p603_p0 = scmp.ne.s32.totalorder %s29_s28, %s602_s29  ;;  %p608_p2 = scmp.lt.s32.totalorder %s602_s29, %s602_s29 }
   0x7   :  { %p609_p3 = por %p608_p2, %p607_p1 }
   0x9   :  { %p610_p4 = pnand %p609_p3, %p603_p0 }
   0xb   :  { %613 = shalt.err (!%p610_p4)
}
   0xc   :  { %s661_s30 = smov 256   ;;  %s662_s9 = smov 16  }
   0xd   :  { %34 = dma.hbm_to_vmem [thread:$0]  %s864_s3, 4096, %s29_s28, [#allocation3], %s661_s30, %s661_s30, %s662_s9  }
   0xe   :  { %s663_s12 = smov [#allocation5]  }
   0xf   :  { %s42_s13 = sshll.u32 %s663_s12, 4  ;;  %s43_s13 = int_to_ptr.vmem [resolvable:$true] %s42_s13 }
  0x10   :  { %s622_s14 = scalar_lea.vmem %s43_s13, 4096  ;;  %p627_p6 = scmp.lt.s32.totalorder %s43_s13, %s43_s13 }
  0x11   :  { %p623_p5 = scmp.ne.s32.totalorder %s43_s13, %s622_s14  ;;  %p628_p7 = scmp.lt.s32.totalorder %s622_s14, %s622_s14 }
  0x13   :  { %p629_p8 = por %p628_p7, %p627_p6 }
  0x15   :  { %p630_p9 = pnand %p629_p8, %p623_p5 }
  0x17   :  { %633 = shalt.err (!%p630_p9)
}
  0x18   :  { %s664_s15 = smov 128   ;;  %s665_s16 = smov 8  }
  0x19   :  { %48 = dma.hbm_to_vmem [thread:$0]  %s866_s5, 4096, %s43_s13, [#allocation6], %s664_s15, %s664_s15, %s665_s16  }
  0x1a   :  { %654 = dma.done.wait [#allocation3], 4096  }
  0x1b   :  { %655 = vsyncadd [#allocation3], 4294963200 }
  0x1c   :  { %656 = dma.done.wait [#allocation6], 4096  }
  0x1d   :  { %657 = vsyncadd [#allocation6], 4294963200  ;;  %v92_v0 = vld [vmem:[%s862_s1 + $0xf8] sm:$0xff]  ;;  %v91_v2 = vld [vmem:[%s862_s1 + $0xf0] sm:$0xff]  ;;  %v666_v62 = vmov 0.0  }
  0x1e   :  { %v76_v1 = vld [vmem:[%s862_s1 + $0x78] sm:$0xff]  ;;  %504 = vmatprep.subr.mxu0 %v92_v0  ;;  %v75_v3 = vld [vmem:[%s862_s1 + $0x70] sm:$0xff]  ;;  %v90_v4 = vld [vmem:[%s862_s1 + $0xe8] sm:$0xff]  ;;  %302 = vmatprep.mubr.f32.mxu1 %v666_v62 }
  0x1f   :  { %505 = vmatpush3.msra.mxu0 %v76_v1  ;;  %v74_v5 = vld [vmem:[%s862_s1 + $0x68] sm:$0xff]  ;;  %v89_v6 = vld [vmem:[%s862_s1 + $0xe0] sm:$0xff]  ;;  %v88_v8 = vld [vmem:[%s862_s1 + $0xd8] sm:$0xff] }
  0x20   :  { %506 = vmatprep.subr.mxu0 %v91_v2  ;;  %v73_v7 = vld [vmem:[%s862_s1 + $0x60] sm:$0xff]  ;;  %v72_v9 = vld [vmem:[%s862_s1 + $0x58] sm:$0xff]  ;;  %v87_v10 = vld [vmem:[%s862_s1 + $0xd0] sm:$0xff] }
  0x21   :  { %507 = vmatpush3.msra.mxu0 %v75_v3  ;;  %v71_v11 = vld [vmem:[%s862_s1 + $0x50] sm:$0xff]  ;;  %v86_v12 = vld [vmem:[%s862_s1 + $0xc8] sm:$0xff]  ;;  %v85_v15 = vld [vmem:[%s862_s1 + $0xc0] sm:$0xff] }
  0x22   :  { %508 = vmatprep.subr.mxu0 %v90_v4  ;;  %v58_v13 = vld [vmem:[%s861_s0 + $0x8] sm:$0xff]  ;;  %v69_v16 = vld [vmem:[%s862_s1 + $0x40] sm:$0xff]  ;;  %v84_v17 = vld [vmem:[%s862_s1 + $0xb8] sm:$0xff] }
  0x23   :  { %509 = vmatpush3.msra.mxu0 %v74_v5  ;;  %v70_v14 = vld [vmem:[%s862_s1 + $0x48] sm:$0xff]  ;;  %164 = vmatprep.mubr.f32.mxu0 %v58_v13  ;;  %v68_v18 = vld [vmem:[%s862_s1 + $0x38] sm:$0xff]  ;;  %v83_v19 = vld [vmem:[%s862_s1 + $0xb0] sm:$0xff] }
  0x24   :  { %510 = vmatprep.subr.mxu0 %v89_v6  ;;  %v67_v20 = vld [vmem:[%s862_s1 + $0x30] sm:$0xff]  ;;  %v82_v21 = vld [vmem:[%s862_s1 + $0xa8] sm:$0xff]  ;;  %v81_v23 = vld [vmem:[%s862_s1 + $0xa0] sm:$0xff] }
  0x25   :  { %511 = vmatpush3.msra.mxu0 %v73_v7  ;;  %v66_v22 = vld [vmem:[%s862_s1 + $0x28] sm:$0xff]  ;;  %v65_v24 = vld [vmem:[%s862_s1 + $0x20] sm:$0xff]  ;;  %v80_v25 = vld [vmem:[%s862_s1 + $0x98] sm:$0xff] }
  0x26   :  { %512 = vmatprep.subr.mxu0 %v88_v8  ;;  %v64_v26 = vld [vmem:[%s862_s1 + $0x18] sm:$0xff]  ;;  %v79_v27 = vld [vmem:[%s862_s1 + $0x90] sm:$0xff]  ;;  %v78_v29 = vld [vmem:[%s862_s1 + $0x88] sm:$0xff] }
  0x27   :  { %513 = vmatpush3.msra.mxu0 %v72_v9  ;;  %v63_v28 = vld [vmem:[%s862_s1 + $0x10] sm:$0xff]  ;;  %v62_v30 = vld [vmem:[%s862_s1 + $0x8] sm:$0xff]  ;;  %v77_v31 = vld [vmem:[%s862_s1 + $0x80] sm:$0xff] }
  0x28   :  { %514 = vmatprep.subr.mxu0 %v87_v10  ;;  %v61_v32 = vld [vmem:[%s862_s1] sm:$0xff]  ;;  %v225_v39 = vld [vmem:[#allocation2 + $0xf8] sm:$0xff]  ;;  %v224_v40 = vld [vmem:[#allocation2 + $0xf0] sm:$0xff] }
  0x29   :  { %515 = vmatpush3.msra.mxu0 %v71_v11  ;;  %v57_v33 = vld [vmem:[%s861_s0] sm:$0xff]  ;;  %v223_v41 = vld [vmem:[#allocation2 + $0xe8] sm:$0xff]  ;;  %238 = vmatprep.subr.mxu1 %v225_v39  ;;  %v221_v43 = vld [vmem:[#allocation2 + $0xd8] sm:$0xff] }
  0x2a   :  { %516 = vmatprep.subr.mxu0 %v86_v12  ;;  %v502_v36 = vld [vmem:[%s863_s2] ss:$0 sm:$0xff]  ;;  %239 = vmatpush1.msra.mxu1 %v224_v40  ;;  %v220_v44 = vld [vmem:[#allocation2 + $0xd0] sm:$0xff]  ;;  %v219_v45 = vld [vmem:[#allocation2 + $0xc8] sm:$0xff] }
  0x2b   :  { %517 = vmatpush3.msra.mxu0 %v70_v14  ;;  %v222_v42 = vld [vmem:[#allocation2 + $0xe0] sm:$0xff]  ;;  %240 = vmatprep.subr.mxu1 %v223_v41  ;;  %v217_v47 = vld [vmem:[#allocation2 + $0xb8] sm:$0xff]  ;;  %v216_v48 = vld [vmem:[#allocation2 + $0xb0] sm:$0xff] }
  0x2c   :  { %518 = vmatprep.subr.mxu0 %v85_v15  ;;  %241 = vmatpush1.msra.mxu1 %v222_v42  ;;  %v218_v46 = vld [vmem:[#allocation2 + $0xc0] sm:$0xff]  ;;  %v215_v53 = vld [vmem:[#allocation2 + $0xa8] sm:$0xff]  ;;  %v213_v55 = vld [vmem:[#allocation2 + $0x98] sm:$0xff] }
  0x2d   :  { %519 = vmatpush3.msra.mxu0 %v69_v16  ;;  %242 = vmatprep.subr.mxu1 %v221_v43  ;;  %v214_v54 = vld [vmem:[#allocation2 + $0xa0] sm:$0xff]  ;;  %v212_v56 = vld [vmem:[#allocation2 + $0x90] sm:$0xff]  ;;  %v211_v57 = vld [vmem:[#allocation2 + $0x88] sm:$0xff] }
  0x2e   :  { %520 = vmatprep.subr.mxu0 %v84_v17  ;;  %243 = vmatpush1.msra.mxu1 %v220_v44  ;;  %v210_v58 = vld [vmem:[#allocation2 + $0x80] sm:$0xff]  ;;  %v209_v59 = vld [vmem:[#allocation2 + $0x78] sm:$0xff]  ;;  %v208_v60 = vld [vmem:[#allocation2 + $0x70] sm:$0xff] }
  0x2f   :  { %521 = vmatpush3.msra.mxu0 %v68_v18  ;;  %244 = vmatprep.subr.mxu1 %v219_v45  ;;  %v207_v61 = vld [vmem:[#allocation2 + $0x68] sm:$0xff]  ;;  %v206_v63 = vld [vmem:[#allocation2 + $0x60] sm:$0xff]  ;;  %v205_v0 = vld [vmem:[#allocation2 + $0x58] sm:$0xff]  ;;  %v59_v18 = vlaneseq }
  0x30   :  { %522 = vmatprep.subr.mxu0 %v83_v19  ;;  %245 = vmatpush1.msra.mxu1 %v218_v46  ;;  %v204_v1 = vld [vmem:[#allocation2 + $0x50] sm:$0xff]  ;;  %v203_v2 = vld [vmem:[#allocation2 + $0x48] sm:$0xff]  ;;  %v202_v3 = vld [vmem:[#allocation2 + $0x40] sm:$0xff] }
  0x31   :  { %523 = vmatpush3.msra.mxu0 %v67_v20  ;;  %246 = vmatprep.subr.mxu1 %v217_v47  ;;  %v201_v4 = vld [vmem:[#allocation2 + $0x38] sm:$0xff]  ;;  %v200_v5 = vld [vmem:[#allocation2 + $0x30] sm:$0xff]  ;;  %v199_v6 = vld [vmem:[#allocation2 + $0x28] sm:$0xff]  ;;  %v229_v19 = vshrl.u32 %v59_v18, 7 }
  0x32   :  { %524 = vmatprep.subr.mxu0 %v82_v21  ;;  %247 = vmatpush1.msra.mxu1 %v216_v48  ;;  %v198_v7 = vld [vmem:[#allocation2 + $0x20] sm:$0xff]  ;;  %v197_v8 = vld [vmem:[#allocation2 + $0x18] sm:$0xff]  ;;  %v196_v9 = vld [vmem:[#allocation2 + $0x10] sm:$0xff] }
  0x33   :  { %525 = vmatpush3.msra.mxu0 %v66_v22  ;;  %248 = vmatprep.subr.mxu1 %v215_v53  ;;  %v195_v10 = vld [vmem:[#allocation2 + $0x8] sm:$0xff]  ;;  %v194_v11 = vld [vmem:[#allocation2] sm:$0xff]  ;;  %v230_v20 = vsub.s32 0, %v229_v19  ;;  %v234_v21 = vsub.s32 1, %v229_v19  ;;  %v352_v53 = vld [vmem:[#allocation5 + $0x50] sm:$0xff] }
  0x34   :  { %526 = vmatprep.subr.mxu0 %v81_v23  ;;  %249 = vmatpush1.msra.mxu1 %v214_v54  ;;  %v226_v22 = vld [vmem:[%s865_s4] sm:$0x3]  ;;  %v367_v54 = vld [vmem:[#allocation5 + $0xc8] sm:$0xff] }
  0x35   :  { %527 = vmatpush3.msra.mxu0 %v65_v24  ;;  %250 = vmatprep.subr.mxu1 %v213_v55  ;;  %v231_v23 = vrot.slane %v226_v22, %v230_v20  ;;  %v235_v24 = vrot.slane %v226_v22, %v234_v21  ;;  %v351_v55 = vld [vmem:[#allocation5 + $0x48] sm:$0xff]  ;;  %v503_v22 = vld [vmem:[%s867_s6] ss:$0 sm:$0xff]  ;;  %s667_s6 = smov [#allocation7]  }
  0x36   :  { %528 = vmatprep.subr.mxu0 %v80_v25  ;;  %251 = vmatpush1.msra.mxu1 %v212_v56  ;;  %v366_v56 = vld [vmem:[#allocation5 + $0xc0] sm:$0xff]  ;;  %v363_v62 = vld [vmem:[#allocation5 + $0xa8] sm:$0xff]  ;;  %s488_s17 = sshll.u32 %s667_s6, 4  ;;  %s489_s17 = int_to_ptr.vmem [resolvable:$true] %s488_s17 }
  0x37   :  { %529 = vmatpush3.msra.mxu0 %v64_v26  ;;  %252 = vmatprep.subr.mxu1 %v211_v57  ;;  %v350_v57 = vld [vmem:[#allocation5 + $0x40] sm:$0xff]  ;;  %s634_s18 = scalar_lea.vmem %s489_s17, 128  ;;  %p639_p11 = scmp.lt.s32.totalorder %s489_s17, %s489_s17 }
  0x38   :  { %530 = vmatprep.subr.mxu0 %v79_v27  ;;  %253 = vmatpush1.msra.mxu1 %v210_v58  ;;  %v365_v58 = vld [vmem:[#allocation5 + $0xb8] sm:$0xff]  ;;  %p635_p10 = scmp.ne.s32.totalorder %s489_s17, %s634_s18  ;;  %p640_p12 = scmp.lt.s32.totalorder %s634_s18, %s634_s18 }
  0x39   :  { %531 = vmatpush3.msra.mxu0 %v63_v28  ;;  %254 = vmatprep.subr.mxu1 %v209_v59  ;;  %v349_v59 = vld [vmem:[#allocation5 + $0x38] sm:$0xff] }
  0x3a   :  { %532 = vmatprep.subr.mxu0 %v78_v29  ;;  %255 = vmatpush1.msra.mxu1 %v208_v60  ;;  %v364_v60 = vld [vmem:[#allocation5 + $0xb0] sm:$0xff]  ;;  %p641_p13 = por %p640_p12, %p639_p11 }
  0x3b   :  { %533 = vmatpush3.msra.mxu0 %v62_v30  ;;  %256 = vmatprep.subr.mxu1 %v207_v61  ;;  %v373_v30 = vld [vmem:[#allocation5 + $0xf8] sm:$0xff]  ;;  %v348_v61 = vld [vmem:[#allocation5 + $0x30] sm:$0xff] }
  0x3c   :  { %534 = vmatprep.subr.mxu0 %v77_v31  ;;  %257 = vmatpush1.msra.mxu1 %v206_v63  ;;  %v357_v31 = vld [vmem:[#allocation5 + $0x78] sm:$0xff]  ;;  %v347_v63 = vld [vmem:[#allocation5 + $0x28] sm:$0xff]  ;;  %p642_p0 = pnand %p641_p13, %p635_p10 }
  0x3d   :  { %535 = vmatpush3.msra.mxu0 %v61_v32  ;;  %258 = vmatprep.subr.mxu1 %v205_v0  ;;  %v372_v32 = vld [vmem:[#allocation5 + $0xf0] sm:$0xff]  ;;  %v362_v0 = vld [vmem:[#allocation5 + $0xa0] sm:$0xff] }
  0x3e   :  { %165 = vmatmul.mubr.f32.vlgmr.msra.gmra.mxu0 %v57_v33  ;;  %259 = vmatpush1.msra.mxu1 %v204_v1  ;;  %v356_v33 = vld [vmem:[#allocation5 + $0x70] sm:$0xff]  ;;  %v346_v1 = vld [vmem:[#allocation5 + $0x20] sm:$0xff] }
  0x3f   :  { %260 = vmatprep.subr.mxu1 %v203_v2  ;;  %539 = vmatprep.subr.mxu0 %v373_v30  ;;  %v361_v2 = vld [vmem:[#allocation5 + $0x98] sm:$0xff] }
  0x40   :  { %261 = vmatpush1.msra.mxu1 %v202_v3  ;;  %540 = vmatpush3.msra.mxu0 %v357_v31  ;;  %v345_v3 = vld [vmem:[#allocation5 + $0x18] sm:$0xff]  ;;  %v60_v31 = vand.u32 127, %v59_v18 }
  0x41   :  { %262 = vmatprep.subr.mxu1 %v201_v4  ;;  %541 = vmatprep.subr.mxu0 %v372_v32  ;;  %v360_v4 = vld [vmem:[#allocation5 + $0x90] sm:$0xff] }
  0x42   :  { %263 = vmatpush1.msra.mxu1 %v200_v5  ;;  %542 = vmatpush3.msra.mxu0 %v356_v33  ;;  %v344_v5 = vld [vmem:[#allocation5 + $0x10] sm:$0xff]  ;;  %vm189_vm4 = vcmp.eq.s32.totalorder %v60_v31, 0  ;;  %vm337_vm5 = vcmp.eq.s32.totalorder %v60_v31, 1  ;;  %vm469_vm6 = vcmp.eq.s32.totalorder %v60_v31, 2 }
  0x43   :  { %264 = vmatprep.subr.mxu1 %v199_v6  ;;  %v359_v6 = vld [vmem:[#allocation5 + $0x88] sm:$0xff] }
  0x44   :  { %265 = vmatpush1.msra.mxu1 %v198_v7  ;;  %v343_v7 = vld [vmem:[#allocation5 + $0x8] sm:$0xff] }
  0x45   :  { %266 = vmatprep.subr.mxu1 %v197_v8  ;;  %v358_v8 = vld [vmem:[#allocation5 + $0x80] sm:$0xff] }
  0x46   :  { %267 = vmatpush1.msra.mxu1 %v196_v9  ;;  %v342_v9 = vld [vmem:[#allocation5] sm:$0xff] }
  0x47   :  { %268 = vmatprep.subr.mxu1 %v195_v10 }
  0x48   :  { %269 = vmatpush1.msra.mxu1 %v194_v11 }
  0xfe   :  { %v536_v34 = vpop.f32.mrf.mxu0 }
 0x100   :  { %v537_v35 = vpop.f32.mrf.mxu0 }
 0x101   :  { %v538_v37 = vadd.f32 %v537_v35, %v536_v34  ;;  %v371_v34 = vld [vmem:[#allocation5 + $0xe8] sm:$0xff] }
 0x102   :  { %v355_v35 = vld [vmem:[#allocation5 + $0x68] sm:$0xff]  ;;  %543 = vmatprep.subr.mxu0 %v371_v34 }
 0x103   :  { %v167_v38 = vadd.f32 %v538_v37, %v502_v36  ;;  %v370_v36 = vld [vmem:[#allocation5 + $0xe0] sm:$0xff]  ;;  %544 = vmatpush3.msra.mxu0 %v355_v35 }
 0x104   :  { %v354_v37 = vld [vmem:[#allocation5 + $0x60] sm:$0xff]  ;;  %545 = vmatprep.subr.mxu0 %v370_v36 }
 0x105   :  { %170 = vadd.xlane.f32.xlu0 %v167_v38  ;;  %546 = vmatpush3.msra.mxu0 %v354_v37 }
 0x18e   :  { %v171_v49 = vpop.xlane.xlu0 %170 }
 0x18f   :  { %v173_v50 = vmul.f32 0.0078125, %v171_v49  ;;  %v353_v49 = vld [vmem:[#allocation5 + $0x58] sm:$0xff] }
 0x191   :  { %v824_v51 = vsub.f32 %v167_v38, %v173_v50  ;;  %v369_v38 = vld [vmem:[#allocation5 + $0xd8] sm:$0xff]  ;;  %v368_v50 = vld [vmem:[#allocation5 + $0xd0] sm:$0xff] }
 0x192   :  { %547 = vmatprep.subr.mxu0 %v369_v38 }
 0x193   :  { %v828_v52 = vmul.f32 %v824_v51, %v824_v51  ;;  %548 = vmatpush3.msra.mxu0 %v353_v49  ;;  %vm183_vm2 = vcmp.gt.f32.partialorder %v824_v51, 0.0 }
 0x194   :  { %549 = vmatprep.subr.mxu0 %v368_v50 }
 0x195   :  { %176 = vadd.xlane.f32.xlu0 %v828_v52  ;;  %550 = vmatpush3.msra.mxu0 %v352_v53 }
 0x196   :  { %551 = vmatprep.subr.mxu0 %v367_v54 }
 0x197   :  { %552 = vmatpush3.msra.mxu0 %v351_v55 }
 0x198   :  { %553 = vmatprep.subr.mxu0 %v366_v56 }
 0x199   :  { %554 = vmatpush3.msra.mxu0 %v350_v57 }
 0x19a   :  { %555 = vmatprep.subr.mxu0 %v365_v58 }
 0x19b   :  { %556 = vmatpush3.msra.mxu0 %v349_v59 }
 0x19c   :  { %557 = vmatprep.subr.mxu0 %v364_v60 }
 0x19d   :  { %558 = vmatpush3.msra.mxu0 %v348_v61 }
 0x19e   :  { %559 = vmatprep.subr.mxu0 %v363_v62 }
 0x19f   :  { %560 = vmatpush3.msra.mxu0 %v347_v63 }
 0x1a0   :  { %561 = vmatprep.subr.mxu0 %v362_v0 }
 0x1a1   :  { %562 = vmatpush3.msra.mxu0 %v346_v1 }
 0x1a2   :  { %563 = vmatprep.subr.mxu0 %v361_v2 }
 0x1a3   :  { %564 = vmatpush3.msra.mxu0 %v345_v3 }
 0x1a4   :  { %565 = vmatprep.subr.mxu0 %v360_v4 }
 0x1a5   :  { %566 = vmatpush3.msra.mxu0 %v344_v5 }
 0x1a6   :  { %567 = vmatprep.subr.mxu0 %v359_v6 }
 0x1a7   :  { %568 = vmatpush3.msra.mxu0 %v343_v7 }
 0x1a8   :  { %569 = vmatprep.subr.mxu0 %v358_v8 }
 0x1a9   :  { %570 = vmatpush3.msra.mxu0 %v342_v9 }
 0x21e   :  { %v177_v12 = vpop.xlane.xlu0 %176 }
 0x21f   :  { %v178_v13 = vmul.f32 0.0078125, %v177_v12 }
 0x221   :  { %v831_v14 = vadd.f32 1e-05, %v178_v13 }
 0x223   :  { %582 = vrsqrt.f32 %v831_v14 }
 0x230   :  { %v583_v15 = vpop.eup %582 }
 0x231   :  { %v181_v16 = vmul.f32 %v583_v15, %v824_v51 }
 0x233   :  { %v182_v17 = vmax.f32 %v181_v16, 0.0 }
 0x235   :  { %303 = vmatmul.mubr.f32.vlgmr.msra.gmra.mxu1 %v182_v17 }
 0x2f5   :  { %v304_v25 = vpop.f32.mrf.mxu1 }
 0x2f6   :  { %v305_v27 = vadd.f32 %v304_v25, %v231_v23  ;;  %v184_v25 = vsel %vm183_vm2, %v828_v52, 0.0 }
 0x2f7   :  { %v306_v26 = vpop.f32.mrf.mxu1 }
 0x2f8   :  { %v307_v28 = vadd.f32 %v306_v26, %v235_v24 }
 0x2fa   :  { %v309_v29 = vadd.f32 %v307_v28, %v305_v27 }
 0x2fc   :  { %310 = vadd.xlane.f32.xlu1 %v309_v29 }
 0x385   :  { %v311_v39 = vpop.xlane.xlu1 %310 }
 0x386   :  { %v313_v40 = vmul.f32 0.00390625, %v311_v39 }
 0x388   :  { %v839_v41 = vsub.f32 %v305_v27, %v313_v40  ;;  %v315_v42 = vsub.f32 %v307_v28, %v313_v40 }
 0x38a   :  { %v316_v43 = vmul.f32 %v839_v41, %v839_v41  ;;  %v317_v44 = vmul.f32 %v315_v42, %v315_v42  ;;  %vm328_vm0 = vcmp.gt.f32.partialorder %v839_v41, 0.0  ;;  %vm329_vm1 = vcmp.gt.f32.partialorder %v315_v42, 0.0 }
 0x38c   :  { %v318_v45 = vadd.f32 %v317_v44, %v316_v43  ;;  %v330_v46 = vsel %vm328_vm0, %v316_v43, 0.0  ;;  %v331_v47 = vsel %vm329_vm1, %v317_v44, 0.0 }
 0x38d   :  { %v844_v48 = vadd.f32 %v331_v47, %v330_v46 }
 0x38e   :  { %319 = vadd.xlane.f32.xlu1 %v318_v45 }
 0x417   :  { %v320_v10 = vpop.xlane.xlu1 %319 }
 0x418   :  { %v321_v11 = vmul.f32 0.00390625, %v320_v10 }
 0x41a   :  { %v322_v12 = vadd.f32 1e-05, %v321_v11 }
 0x41c   :  { %584 = vrsqrt.f32 %v322_v12 }
 0x41d   :  { %586 = vrcp.f32 %v831_v14 }
 0x41e   :  { %588 = vrcp.f32 %v322_v12 }
 0x429   :  { %v585_v13 = vpop.eup %584 }
 0x42a   :  { %v325_v15 = vmul.f32 %v585_v13, %v315_v42  ;;  %v324_v16 = vmul.f32 %v585_v13, %v839_v41  ;;  %v587_v52 = vpop.eup %586 }
 0x42b   :  { %v589_v36 = vpop.eup %588 }
 0x42c   :  { %v327_v17 = vmax.f32 %v325_v15, 0.0  ;;  %v326_v19 = vmax.f32 %v324_v16, 0.0 }
 0x42e   :  { %445 = vmatprep.mubr.f32.mxu0 %v327_v17 }
 0x42f   :  { %446 = vmatmul.mubr.f32.vlgmr.msra.gmra.mxu0 %v326_v19 }
 0x4ef   :  { %v571_v20 = vpop.f32.mrf.mxu0 }
 0x4f1   :  { %v572_v21 = vpop.f32.mrf.mxu0 }
 0x4f2   :  { %v573_v23 = vadd.f32 %v572_v21, %v571_v20 }
 0x4f4   :  { %v448_v24 = vadd.f32 %v573_v23, %v503_v22 }
 0x4f6   :  { %451 = vadd.xlane.f32.xlu0 %v448_v24 }
 0x4fa   :  { %185 = vadd.xlane.f32.xlu0 %v184_v25 }
 0x57f   :  { %v452_v26 = vpop.xlane.xlu0 %451 }
 0x580   :  { %v453_v27 = vmul.f32 0.0078125, %v452_v26 }
 0x582   :  { %v454_v28 = vsub.f32 %v448_v24, %v453_v27 }
 0x583   :  { %v186_v32 = vpop.xlane.xlu0 %185 }
 0x584   :  { %v455_v29 = vmul.f32 %v454_v28, %v454_v28  ;;  %vm463_vm3 = vcmp.gt.f32.partialorder %v454_v28, 0.0  ;;  %v188_v34 = vmul.f32 %v587_v52, %v186_v32 }
 0x586   :  { %456 = vadd.xlane.f32.xlu1 %v455_v29  ;;  %v464_v30 = vsel %vm463_vm3, %v455_v29, 0.0  ;;  %v192_v39 = vsel %vm189_vm4, %v188_v34, 0.0 }
 0x587   :  { %465 = vadd.xlane.f32.xlu0 %v464_v30 }
 0x58a   :  { %333 = vadd.xlane.f32.xlu1 %v844_v48 }
 0x60f   :  { %v457_v51 = vpop.xlane.xlu1 %456 }
 0x610   :  { %v458_v33 = vmul.f32 0.0078125, %v457_v51  ;;  %v466_v42 = vpop.xlane.xlu0 %465 }
 0x612   :  { %v459_v35 = vadd.f32 1e-05, %v458_v33 }
 0x613   :  { %v334_v37 = vpop.xlane.xlu1 %333 }
 0x614   :  { %590 = vrsqrt.f32 %v459_v35  ;;  %v336_v38 = vmul.f32 %v589_v36, %v334_v37 }
 0x615   :  { %592 = vrcp.f32 %v459_v35 }
 0x616   :  { %v340_v40 = vsel %vm337_vm5, %v336_v38, 0.0 }
 0x617   :  { %v341_v41 = vadd.f32 %v340_v40, %v192_v39 }
 0x621   :  { %v591_v14 = vpop.eup %590 }
 0x622   :  { %v593_v18 = vpop.eup %592  ;;  %v461_v43 = vmul.f32 %v591_v14, %v454_v28 }
 0x623   :  { %v468_v44 = vmul.f32 %v593_v18, %v466_v42 }
 0x624   :  { %v462_v45 = vmax.f32 %v461_v43, 0.0 }
 0x625   :  { %v472_v46 = vsel %vm469_vm6, %v468_v44, 0.0 }
 0x626   :  { %v473_v47 = vadd.f32 %v472_v46, %v341_v41  ;;  %474 = vst [vmem:[#allocation7] sm:$0xff] %v462_v45 }
 0x627   :  { %645 = shalt.err (!%p642_p0)
}
 0x628   :  { %491 = dma.vmem_to_hbm [thread:$0]  %s489_s17, 128, %s868_s7, [#allocation4]   ;;  %v475_v48 = vrot.slane %v473_v47, 4 }
 0x62a   :  { %v476_v49 = vadd.f32 %v475_v48, %v473_v47 }
 0x62c   :  { %v477_v50 = vrot.slane %v476_v49, 2 }
 0x62e   :  { %v478_v53 = vadd.f32 %v477_v50, %v476_v49 }
 0x630   :  { %v479_v54 = vrot.slane %v478_v53, 1 }
 0x632   :  { %v480_v55 = vadd.f32 %v479_v54, %v478_v53 }
 0x634   :  { %481 = vst [vmem:[%s869_s8] sm:$0x1] %v480_v55 }
 0x635   :  { %658 = dma.done.wait [#allocation4], 128  }
 0x636   :  { %659 = vsyncadd [#allocation4], 4294967168 }
 0x637   :  { %499 = vsyncpa [#allocation3], 1 }
 0x638   :  { %500 = vsyncpa [#allocation6], 1 }
 0x639   :  { %501 = vsyncpa [#allocation4], 1 }

</bundles_post_ra>
